<compile_context>
chip_gen: v7x
topology: tpu7x:2x2x1
jax: 0.10.0
libtpu: 0.0.40
codegen_flags: <defaults>
</compile_context>

<pallas_src>
import functools
import numpy as np

import jax
import jax.numpy as jnp
from jax.experimental import pallas as pl
from jax.experimental.pallas import tpu as pltpu


def _round_up(x, n):
    return (x + n - 1) // n * n


def _arcface_kernel(xn_ref, w_ref, lbl_ref, out_ref, *,
                    cos_m, sin_m, th, mm, s, easy_margin, tile_c):
    # xn_ref  : (tile_b, D)      L2-normalized rows, compute dtype (resident per B tile)
    # w_ref   : (tile_c, D)      RAW weight rows, native layout, compute dtype (streamed)
    # lbl_ref : (tile_b, 1)      int32 class index per row
    # out_ref : (tile_b, tile_c) scaled f32 logits tile

    # Fused per-class (per-row) weight L2 normalization; f32 norm math, cost is
    # hidden under the weight-tile DMA.
    w = w_ref[...]
    w32 = w.astype(jnp.float32)
    inv_norm = jax.lax.rsqrt(
        jnp.maximum(jnp.sum(w32 * w32, axis=1, keepdims=True), 1e-24))  # (tile_c, 1)
    wn = (w32 * inv_norm).astype(w.dtype)

    # (tile_b, D) . (tile_c, D)^T on the MXU, f32 accumulation (trans_b form;
    # no pre-transposed weight copy in HBM).
    cosine = jax.lax.dot_general(
        xn_ref[...], wn, (((1,), (1,)), ((), ())),
        preferred_element_type=jnp.float32)                              # (tile_b, tile_c)

    sine = jnp.sqrt(jnp.clip(1.0 - cosine * cosine, 0.0, 1.0))
    phi = cosine * cos_m - sine * sin_m
    if easy_margin:
        phi = jnp.where(cosine > 0.0, phi, cosine)
    else:
        phi = jnp.where(cosine > th, phi, cosine - mm)

    # Rebuild the one-hot mask for this C tile from the int32 indices.
    col = (jax.lax.broadcasted_iota(jnp.int32, cosine.shape, 1)
           + pl.program_id(1) * tile_c)
    mask = col == lbl_ref[...]                                           # (tile_b, tile_c)

    out_ref[...] = (jnp.where(mask, phi, cosine) * s).astype(out_ref.dtype)


def arcface_forward(x, weight, label_idx, *, s=30.0, m=0.5, easy_margin=False,
                    compute_dtype=jnp.bfloat16, tile_c=None, tile_b=None,
                    vmem_budget_frac=0.7):
    """ArcFace forward.  `label_idx` is an int32 (B,) vector of class indices
    (equivalent to the one-hot `label` matrix of the PyTorch module).
    `weight` is passed raw in its native (C, D) layout; normalization is fused."""
    B, D = x.shape
    C, D2 = weight.shape
    assert D == D2 and label_idx.shape == (B,)

    cos_m = float(np.cos(m))
    sin_m = float(np.sin(m))
    th = float(np.cos(np.pi - m))
    mm = float(np.sin(np.pi - m) * m)

    # Per-sample L2 normalization of x (tiny: B x D), done once in f32, then cast.
    x = x.astype(jnp.float32)
    xn = x * jax.lax.rsqrt(
        jnp.maximum(jnp.sum(x * x, axis=1, keepdims=True), 1e-24))
    xn = xn.astype(compute_dtype)
    w = weight.astype(compute_dtype)            # raw; per-row norm fused in-kernel
    lbl2d = label_idx.astype(jnp.int32).reshape(B, 1)

    itemsize = jnp.dtype(compute_dtype).itemsize

    # Per-TensorCore VMEM capacity; conservative v7x fallback if the query fails.
    try:
        vmem_cap = int(pltpu.get_tpu_info().vmem_capacity_bytes)
    except Exception:
        vmem_cap = 64 << 20
    budget = int(vmem_cap * vmem_budget_frac)

    # Batch tile (second parallel grid axis keeps the output double-buffer small).
    if tile_b is None:
        tile_b = B if B <= 512 else 512
    tile_b = min(tile_b, B)
    if tile_b != B:
        tile_b = max(8, tile_b // 8 * 8)

    # Class tile sized from the double-buffered footprint (big tiles amortize
    # the ~0.35 us per-grid-step overhead; cap differs per generation via VMEM).
    if tile_c is None:
        fixed = 2 * tile_b * D * itemsize + (2 << 20)        # resident xn + slack
        per_col = 2 * D * itemsize + 2 * tile_b * 4          # W stream + out tile
        tile_c = (budget - fixed) // per_col
        tile_c = int(max(128, (tile_c // 128) * 128))
    tile_c = min(tile_c, 16384, _round_up(C, 128))
    tile_c = max(128, (tile_c // 128) * 128)

    n_b = pl.cdiv(B, tile_b)
    n_c = pl.cdiv(C, tile_c)

    # Scoped VMEM limit derived from the actual buffer footprint (+ headroom).
    footprint = (2 * tile_b * D * itemsize                    # xn pipeline buffers
                 + 2 * tile_c * D * itemsize                  # W stream (double buffer)
                 + 2 * tile_b * tile_c * 4                    # out tile (double buffer)
                 + 2 * _round_up(tile_b, 8) * 128 * 4)        # label block (lane-padded)
    vmem_limit = int(min(max(footprint + (8 << 20), 32 << 20), vmem_cap))

    kernel = functools.partial(
        _arcface_kernel,
        cos_m=cos_m, sin_m=sin_m, th=th, mm=mm, s=float(s),
        easy_margin=easy_margin, tile_c=tile_c)

    out = pl.pallas_call(
        kernel,
        out_shape=jax.ShapeDtypeStruct((B, C), jnp.float32),
        grid=(n_b, n_c),
        in_specs=[
            pl.BlockSpec((tile_b, D), lambda i, j: (i, 0)),   # xn: resident per B tile
            pl.BlockSpec((tile_c, D), lambda i, j: (j, 0)),   # raw W tiles, native layout
            pl.BlockSpec((tile_b, 1), lambda i, j: (i, 0)),   # label indices
        ],
        out_specs=pl.BlockSpec((tile_b, tile_c), lambda i, j: (i, j)),
        compiler_params=pltpu.CompilerParams(
            dimension_semantics=("parallel", "parallel"),     # megacore-shardable
            vmem_limit_bytes=vmem_limit),
    )(xn, w, lbl2d)

    return out


def _reference(x, weight, label, *, s=30.0, m=0.5, easy_margin=False):
    cos_m, sin_m = np.cos(m), np.sin(m)
    th, mm = np.cos(np.pi - m), np.sin(np.pi - m) * m
    xn = x / jnp.maximum(jnp.linalg.norm(x, axis=1, keepdims=True), 1e-12)
    wn = weight / jnp.maximum(jnp.linalg.norm(weight, axis=1, keepdims=True), 1e-12)
    cosine = xn @ wn.T
    sine = jnp.sqrt(jnp.clip(1.0 - cosine ** 2, 0.0, 1.0))
    phi = cosine * cos_m - sine * sin_m
    phi = jnp.where(cosine > 0, phi, cosine) if easy_margin \
        else jnp.where(cosine > th, phi, cosine - mm)
    return (label * phi + (1.0 - label) * cosine) * s


if __name__ == "__main__":
    # Small shapes consistent with the module: batch=8, in_features=128, out_features=256.
    B, IN_FEATURES, OUT_FEATURES = 8, 128, 256

    key = jax.random.PRNGKey(0)
    k_x, k_w, k_lbl = jax.random.split(key, 3)

    x = jax.random.normal(k_x, (B, IN_FEATURES), dtype=jnp.float32)

    # Deterministic xavier_uniform init for the weight (out_features, in_features).
    bound = float(np.sqrt(6.0 / (IN_FEATURES + OUT_FEATURES)))
    weight = jax.random.uniform(
        k_w, (OUT_FEATURES, IN_FEATURES), dtype=jnp.float32,
        minval=-bound, maxval=bound)

    # Integer class labels (equivalent to the one-hot matrix of the module).
    label_idx = jax.random.randint(k_lbl, (B,), 0, OUT_FEATURES, dtype=jnp.int32)

    label = jax.nn.one_hot(label_idx, OUT_FEATURES, dtype=jnp.float32)
    ref = _reference(x, weight, label, s=30.0, m=0.5, easy_margin=False)

    # Exact path (f32 streaming): tight tolerance vs. the PyTorch-equivalent reference.
    out_f32 = arcface_forward(x, weight, label_idx, s=30.0, m=0.5,
                              easy_margin=False, compute_dtype=jnp.float32)
    out_f32 = jax.block_until_ready(out_f32)
    np.testing.assert_allclose(np.asarray(out_f32), np.asarray(ref), rtol=1e-5, atol=1e-5)

    # Fast path (default bf16 streams, f32 accumulation / margin math): loose sanity check.
    out_bf16 = arcface_forward(x, weight, label_idx, s=30.0, m=0.5,
                               easy_margin=False, compute_dtype=jnp.bfloat16)
    out_bf16 = jax.block_until_ready(out_bf16)
    np.testing.assert_allclose(np.asarray(out_bf16), np.asarray(ref), rtol=0.0, atol=1.0)

    print("KERNEL_OK")
</pallas_src>

<mosaic_0001>
module attributes {stable_mosaic.version = 11 : i64} {
  func.func @_arcface_kernel(%arg0: i32, %arg1: i32, %arg2: memref<8x128xf32, #tpu.memory_space<vmem>>, %arg3: memref<256x128xf32, #tpu.memory_space<vmem>>, %arg4: memref<8x1xi32, #tpu.memory_space<vmem>>, %arg5: memref<8x256xf32, #tpu.memory_space<vmem>>) attributes {dimension_semantics = [#tpu.dimension_semantics<parallel>, #tpu.dimension_semantics<parallel>], iteration_bounds = array<i64: 1, 1>, scalar_prefetch = 0 : i64, scratch_operands = 0 : i64, tpu.core_type = #tpu.core_type<tc>, window_params = [{transform_indices = @transform_0, window_bounds = array<i64: 8, 128>}, {transform_indices = @transform_1, window_bounds = array<i64: 256, 128>}, {transform_indices = @transform_2, window_bounds = array<i64: 8, 1>}, {transform_indices = @transform_3, window_bounds = array<i64: 8, 256>}]} {
    %c0 = arith.constant 0 : index
    %c0_0 = arith.constant 0 : index
    %0 = vector.load %arg3[%c0, %c0_0] : memref<256x128xf32, #tpu.memory_space<vmem>>, vector<256x128xf32>
    %1 = arith.mulf %0, %0 : vector<256x128xf32>
    %cst = arith.constant dense<0.000000e+00> : vector<256xf32>
    %2 = vector.multi_reduction <add>, %1, %cst [1] : vector<256x128xf32> to vector<256xf32>
    %3 = vector.shape_cast %2 : vector<256xf32> to vector<256x1xf32>
    %cst_1 = arith.constant 1.000000e-24 : f32
    %4 = vector.broadcast %cst_1 : f32 to vector<256x1xf32>
    %5 = arith.maximumf %3, %4 : vector<256x1xf32>
    %6 = math.rsqrt %5 : vector<256x1xf32>
    %7 = vector.broadcast %6 : vector<256x1xf32> to vector<256x128xf32>
    %8 = arith.mulf %0, %7 : vector<256x128xf32>
    %c0_2 = arith.constant 0 : index
    %c0_3 = arith.constant 0 : index
    %9 = vector.load %arg2[%c0_2, %c0_3] : memref<8x128xf32, #tpu.memory_space<vmem>>, vector<8x128xf32>
    %cst_4 = arith.constant dense<0.000000e+00> : vector<8x256xf32>
    %10 = tpu.matmul %9, %8, %cst_4 {dimension_numbers = #tpu.dot_dimension_numbers<[1], [1], [0], [0], [0, 0, 1, 0], [], []>} : vector<8x128xf32>, vector<256x128xf32>, vector<8x256xf32> -> vector<8x256xf32>
    %11 = arith.mulf %10, %10 : vector<8x256xf32>
    %cst_5 = arith.constant 1.000000e+00 : f32
    %12 = vector.broadcast %cst_5 : f32 to vector<8x256xf32>
    %13 = arith.subf %12, %11 : vector<8x256xf32>
    %cst_6 = arith.constant 0.000000e+00 : f32
    %cst_7 = arith.constant 1.000000e+00 : f32
    %14 = vector.broadcast %cst_6 : f32 to vector<8x256xf32>
    %15 = arith.maximumf %14, %13 : vector<8x256xf32>
    %16 = vector.broadcast %cst_7 : f32 to vector<8x256xf32>
    %17 = arith.minimumf %16, %15 : vector<8x256xf32>
    %18 = math.sqrt %17 : vector<8x256xf32>
    %cst_8 = arith.constant 0.87758255 : f32
    %19 = vector.broadcast %cst_8 : f32 to vector<8x256xf32>
    %20 = arith.mulf %10, %19 : vector<8x256xf32>
    %cst_9 = arith.constant 0.47942555 : f32
    %21 = vector.broadcast %cst_9 : f32 to vector<8x256xf32>
    %22 = arith.mulf %18, %21 : vector<8x256xf32>
    %23 = arith.subf %20, %22 : vector<8x256xf32>
    %cst_10 = arith.constant -0.87758255 : f32
    %24 = vector.broadcast %cst_10 : f32 to vector<8x256xf32>
    %25 = arith.cmpf ogt, %10, %24 : vector<8x256xf32>
    %cst_11 = arith.constant 0.239712775 : f32
    %26 = vector.broadcast %cst_11 : f32 to vector<8x256xf32>
    %27 = arith.subf %10, %26 : vector<8x256xf32>
    %28 = arith.select %25, %23, %27 : vector<8x256xi1>, vector<8x256xf32>
    %29 = tpu.iota {dimensions = array<i32: 1>} : vector<8x256xi32>
    %c256_i32 = arith.constant 256 : i32
    %30 = arith.muli %arg1, %c256_i32 : i32
    %31 = vector.broadcast %30 : i32 to vector<8x256xi32>
    %32 = arith.addi %29, %31 : vector<8x256xi32>
    %c0_12 = arith.constant 0 : index
    %c0_13 = arith.constant 0 : index
    %33 = vector.load %arg4[%c0_12, %c0_13] : memref<8x1xi32, #tpu.memory_space<vmem>>, vector<8x1xi32>
    %34 = vector.broadcast %33 : vector<8x1xi32> to vector<8x256xi32>
    %35 = arith.cmpi eq, %32, %34 : vector<8x256xi32>
    %36 = arith.select %35, %28, %10 : vector<8x256xi1>, vector<8x256xf32>
    %cst_14 = arith.constant 3.000000e+01 : f32
    %37 = vector.broadcast %cst_14 : f32 to vector<8x256xf32>
    %38 = arith.mulf %36, %37 : vector<8x256xf32>
    %c0_15 = arith.constant 0 : index
    %c0_16 = arith.constant 0 : index
    %39 = vector.load %arg5[%c0_15, %c0_16] : memref<8x256xf32, #tpu.memory_space<vmem>>, vector<8x256xf32>
    tpu.vector_store %arg5[%c0_15, %c0_16], %38 {strides = array<i32>} : memref<8x256xf32, #tpu.memory_space<vmem>>, vector<8x256xf32>,
    return
  }
  func.func @transform_0(%arg0: i32, %arg1: i32) -> (i32, i32) {
    %c0_i32 = arith.constant 0 : i32
    %c0_i32_0 = arith.constant 0 : i32
    return %arg0, %c0_i32 : i32, i32
  }
  func.func @transform_1(%arg0: i32, %arg1: i32) -> (i32, i32) {
    %c0_i32 = arith.constant 0 : i32
    %c0_i32_0 = arith.constant 0 : i32
    return %arg1, %c0_i32 : i32, i32
  }
  func.func @transform_2(%arg0: i32, %arg1: i32) -> (i32, i32) {
    %c0_i32 = arith.constant 0 : i32
    %c0_i32_0 = arith.constant 0 : i32
    return %arg0, %c0_i32 : i32, i32
  }
  func.func @transform_3(%arg0: i32, %arg1: i32) -> (i32, i32) {
    %c0_i32 = arith.constant 0 : i32
    return %arg0, %arg1 : i32, i32
  }
}

</mosaic_0001>

<bundles_post_ra>
// kernel: tpu_custom_call.1
= control target key start
LH: loop header
LB: loop body
LE: loop exit
PB: predicated region body
PF: predicated region fallthrough
CT: control target
= control target key end

     0   :  { %8 = vsyncpa [#allocation3], 0  ;;  %s802_s0 = inlined_call_operand.vmem [shape: f32[8,128], index: 0, kind: input, shape index: {}]   ;;  %s803_s1 = inlined_call_operand.hbm [shape: f32[256,128], index: 1, kind: input, shape index: {}]   ;;  %s804_s2 = inlined_call_operand.vmem [shape: s32[8,1], index: 2, kind: input, shape index: {}]   ;;  %s805_s3 = inlined_call_operand.hbm [shape: f32[8,256], index: 3, kind: output, shape index: {}]  }
   0x1   :  { %9 = vsyncpa [#allocation4], 0  ;;  %s583_s12 = smov [#allocation2]   ;;  %s535_s16 = scalar_lea.hbm %s803_s1, 4096 }
   0x2   :  { %s17_s13 = sshll.u32 %s583_s12, 4  ;;  %p536_p0 = scmp.ne.s32.totalorder %s803_s1, %s535_s16  ;;  %s18_s13 = int_to_ptr.vmem [resolvable:$true] %s17_s13 }
   0x3   :  { %p539_p1 = scmp.lt.u32.totalorder %s535_s16, %s803_s1 }
   0x5   :  { %p541_p2 = pnand %p539_p1, %p536_p0 }
   0x7   :  { %544 = shalt.err (!%p541_p2)
}
   0x8   :  { %s545_s21 = scalar_lea.vmem %s18_s13, 4096  ;;  %p550_p4 = scmp.lt.s32.totalorder %s18_s13, %s18_s13 }
   0x9   :  { %p546_p3 = scmp.ne.s32.totalorder %s18_s13, %s545_s21  ;;  %p551_p5 = scmp.lt.s32.totalorder %s545_s21, %s545_s21 }
   0xb   :  { %p552_p6 = por %p551_p5, %p550_p4 }
   0xd   :  { %p553_p7 = pnand %p552_p6, %p546_p3 }
   0xf   :  { %556 = shalt.err (!%p553_p7)
}
  0x10   :  { %s584_s22 = smov 128   ;;  %s585_s23 = smov 8  }
  0x11   :  { %23 = dma.hbm_to_vmem [thread:$0]  %s803_s1, 4096, %s18_s13, [#allocation3], %s584_s22, %s584_s22, %s585_s23  }
  0x12   :  { %579 = dma.done.wait [#allocation3], 4096  }
  0x13   :  { %580 = vsyncadd [#allocation3], 4294963200  ;;  %v620_v0 = vld [vmem:[#allocation2 + $0x80] sm:$0xff]  ;;  %v624_v2 = vld [vmem:[#allocation2 + $0x88] sm:$0xff] }
  0x14   :  { %v622_v1 = vld [vmem:[#allocation2] sm:$0xff]  ;;  %v77_v3 = vmul.f32 %v620_v0, %v620_v0  ;;  %v630_v5 = vld [vmem:[#allocation2 + $0x8] sm:$0xff]  ;;  %v78_v6 = vmul.f32 %v624_v2, %v624_v2  ;;  %v636_v8 = vld [vmem:[#allocation2 + $0x90] sm:$0xff] }
  0x15   :  { %v61_v4 = vmul.f32 %v622_v1, %v622_v1  ;;  %v62_v7 = vmul.f32 %v630_v5, %v630_v5  ;;  %v638_v9 = vld [vmem:[#allocation2 + $0x98] sm:$0xff]  ;;  %v79_v10 = vmul.f32 %v636_v8, %v636_v8  ;;  %v644_v12 = vld [vmem:[#allocation2 + $0x10] sm:$0xff]  ;;  %v652_v16 = vld [vmem:[#allocation2 + $0xa0] sm:$0xff] }
  0x16   :  { %125 = vadd.xlane.f32.xlu0 %v77_v3  ;;  %v80_v11 = vmul.f32 %v638_v9, %v638_v9  ;;  %v646_v13 = vld [vmem:[#allocation2 + $0x18] sm:$0xff]  ;;  %v63_v14 = vmul.f32 %v644_v12, %v644_v12  ;;  %v654_v17 = vld [vmem:[#allocation2 + $0xa8] sm:$0xff]  ;;  %v81_v18 = vmul.f32 %v652_v16, %v652_v16  ;;  %v660_v20 = vld [vmem:[#allocation2 + $0x20] sm:$0xff] }
  0x17   :  { %93 = vadd.xlane.f32.xlu1 %v61_v4  ;;  %v64_v15 = vmul.f32 %v646_v13, %v646_v13  ;;  %v82_v19 = vmul.f32 %v654_v17, %v654_v17  ;;  %v662_v21 = vld [vmem:[#allocation2 + $0x28] sm:$0xff]  ;;  %v65_v22 = vmul.f32 %v660_v20, %v660_v20  ;;  %v668_v24 = vld [vmem:[#allocation2 + $0xb0] sm:$0xff]  ;;  %v670_v25 = vld [vmem:[#allocation2 + $0xb8] sm:$0xff] }
  0x18   :  { %v66_v23 = vmul.f32 %v662_v21, %v662_v21  ;;  %v83_v26 = vmul.f32 %v668_v24, %v668_v24  ;;  %v84_v27 = vmul.f32 %v670_v25, %v670_v25  ;;  %v676_v28 = vld [vmem:[#allocation2 + $0x30] sm:$0xff]  ;;  %v678_v29 = vld [vmem:[#allocation2 + $0x38] sm:$0xff]  ;;  %v684_v32 = vld [vmem:[#allocation2 + $0xc0] sm:$0xff] }
  0x19   :  { %v67_v30 = vmul.f32 %v676_v28, %v676_v28  ;;  %v68_v31 = vmul.f32 %v678_v29, %v678_v29  ;;  %v686_v33 = vld [vmem:[#allocation2 + $0xc8] sm:$0xff]  ;;  %v85_v34 = vmul.f32 %v684_v32, %v684_v32  ;;  %v692_v36 = vld [vmem:[#allocation2 + $0x40] sm:$0xff]  ;;  %v700_v40 = vld [vmem:[#allocation2 + $0xd0] sm:$0xff] }
  0x1a   :  { %127 = vadd.xlane.f32.xlu0 %v78_v6  ;;  %v86_v35 = vmul.f32 %v686_v33, %v686_v33  ;;  %v694_v37 = vld [vmem:[#allocation2 + $0x48] sm:$0xff]  ;;  %v69_v38 = vmul.f32 %v692_v36, %v692_v36  ;;  %v702_v41 = vld [vmem:[#allocation2 + $0xd8] sm:$0xff]  ;;  %v87_v42 = vmul.f32 %v700_v40, %v700_v40  ;;  %v708_v44 = vld [vmem:[#allocation2 + $0x50] sm:$0xff]  ;;  %v586_v6 = vmov 0  }
  0x1b   :  { %95 = vadd.xlane.f32.xlu1 %v62_v7  ;;  %v70_v39 = vmul.f32 %v694_v37, %v694_v37  ;;  %v88_v43 = vmul.f32 %v702_v41, %v702_v41  ;;  %v710_v45 = vld [vmem:[#allocation2 + $0x58] sm:$0xff]  ;;  %v71_v46 = vmul.f32 %v708_v44, %v708_v44  ;;  %v716_v48 = vld [vmem:[#allocation2 + $0xe0] sm:$0xff]  ;;  %v718_v49 = vld [vmem:[#allocation2 + $0xe8] sm:$0xff]  ;;  %466 = vset.pattern.permute.xlu0 %v586_v6 }
  0x1c   :  { %v72_v47 = vmul.f32 %v710_v45, %v710_v45  ;;  %v89_v50 = vmul.f32 %v716_v48, %v716_v48  ;;  %v90_v51 = vmul.f32 %v718_v49, %v718_v49  ;;  %v724_v52 = vld [vmem:[#allocation2 + $0x60] sm:$0xff]  ;;  %v726_v53 = vld [vmem:[#allocation2 + $0x68] sm:$0xff]  ;;  %v732_v56 = vld [vmem:[#allocation2 + $0xf0] sm:$0xff] }
  0x1d   :  { %v73_v54 = vmul.f32 %v724_v52, %v724_v52  ;;  %v74_v55 = vmul.f32 %v726_v53, %v726_v53  ;;  %v734_v57 = vld [vmem:[#allocation2 + $0xf8] sm:$0xff]  ;;  %v91_v58 = vmul.f32 %v732_v56, %v732_v56  ;;  %v740_v60 = vld [vmem:[#allocation2 + $0x70] sm:$0xff]  ;;  %v751_v3 = vld [vmem:[%s802_s0] sm:$0xff]  ;;  %s587_s0 = smov [#allocation5]  }
  0x1e   :  { %129 = vadd.xlane.f32.xlu0 %v79_v10  ;;  %v92_v59 = vmul.f32 %v734_v57, %v734_v57  ;;  %v742_v61 = vld [vmem:[#allocation2 + $0x78] sm:$0xff]  ;;  %v75_v62 = vmul.f32 %v740_v60, %v740_v60  ;;  %427 = vmatprep.mubr.f32.mxu0 %v751_v3  ;;  %v366_v4 = vld [vmem:[%s804_s2] sm:$0xff]  ;;  %s384_s2 = sshll.u32 %s587_s0, 4  ;;  %s385_s2 = int_to_ptr.vmem [resolvable:$true] %s384_s2 }
  0x1f   :  { %131 = vadd.xlane.f32.xlu1 %v80_v11  ;;  %v76_v63 = vmul.f32 %v742_v61, %v742_v61  ;;  %s557_s29 = scalar_lea.vmem %s385_s2, 256  ;;  %p562_p9 = scmp.lt.s32.totalorder %s385_s2, %s385_s2 }
  0x20   :  { %p558_p8 = scmp.ne.s32.totalorder %s385_s2, %s557_s29  ;;  %p563_p10 = scmp.lt.s32.totalorder %s557_s29, %s557_s29 }
  0x22   :  { %97 = vadd.xlane.f32.xlu0 %v63_v14  ;;  %p564_p11 = por %p563_p10, %p562_p9 }
  0x23   :  { %99 = vadd.xlane.f32.xlu1 %v64_v15 }
  0x24   :  { %p565_p12 = pnand %p564_p11, %p558_p8 }
  0x26   :  { %133 = vadd.xlane.f32.xlu0 %v81_v18 }
  0x27   :  { %135 = vadd.xlane.f32.xlu1 %v82_v19 }
  0x2a   :  { %101 = vadd.xlane.f32.xlu0 %v65_v22 }
  0x2b   :  { %103 = vadd.xlane.f32.xlu1 %v66_v23 }
  0x2e   :  { %137 = vadd.xlane.f32.xlu0 %v83_v26 }
  0x2f   :  { %139 = vadd.xlane.f32.xlu1 %v84_v27 }
  0x32   :  { %105 = vadd.xlane.f32.xlu0 %v67_v30 }
  0x33   :  { %107 = vadd.xlane.f32.xlu1 %v68_v31 }
  0x36   :  { %141 = vadd.xlane.f32.xlu0 %v85_v34 }
  0x37   :  { %143 = vadd.xlane.f32.xlu1 %v86_v35 }
  0x3a   :  { %109 = vadd.xlane.f32.xlu0 %v69_v38 }
  0x3b   :  { %111 = vadd.xlane.f32.xlu1 %v70_v39 }
  0x3e   :  { %145 = vadd.xlane.f32.xlu0 %v87_v42 }
  0x3f   :  { %147 = vadd.xlane.f32.xlu1 %v88_v43 }
  0x42   :  { %113 = vadd.xlane.f32.xlu0 %v71_v46 }
  0x43   :  { %115 = vadd.xlane.f32.xlu1 %v72_v47 }
  0x46   :  { %149 = vadd.xlane.f32.xlu0 %v89_v50 }
  0x47   :  { %151 = vadd.xlane.f32.xlu1 %v90_v51 }
  0x4a   :  { %117 = vadd.xlane.f32.xlu0 %v73_v54 }
  0x4b   :  { %119 = vadd.xlane.f32.xlu1 %v74_v55 }
  0x4e   :  { %153 = vadd.xlane.f32.xlu0 %v91_v58 }
  0x4f   :  { %155 = vadd.xlane.f32.xlu1 %v92_v59 }
  0x52   :  { %121 = vadd.xlane.f32.xlu0 %v75_v62 }
  0x53   :  { %123 = vadd.xlane.f32.xlu1 %v76_v63 }
  0x68   :  { %368 = vperm.xlu0 %466, %v366_v4  }
  0xa3   :  { %v126_v7 = vpop.xlane.xlu0 %125 }
  0xa4   :  { %v94_v10 = vpop.xlane.xlu1 %93  ;;  %v173_v11 = vmax.f32 %v126_v7, 1e-24 }
  0xa5   :  { %v157_v14 = vmax.f32 %v94_v10, 1e-24 }
  0xa6   :  { %467 = vrsqrt.f32 %v173_v11 }
  0xa7   :  { %v128_v15 = vpop.xlane.xlu0 %127  ;;  %469 = vrsqrt.f32 %v157_v14 }
  0xa8   :  { %v96_v18 = vpop.xlane.xlu1 %95  ;;  %v174_v19 = vmax.f32 %v128_v15, 1e-24 }
  0xa9   :  { %v158_v22 = vmax.f32 %v96_v18, 1e-24 }
  0xaa   :  { %471 = vrsqrt.f32 %v174_v19 }
  0xab   :  { %473 = vrsqrt.f32 %v158_v22  ;;  %v130_v23 = vpop.xlane.xlu0 %129 }
  0xac   :  { %v132_v26 = vpop.xlane.xlu1 %131  ;;  %v175_v27 = vmax.f32 %v130_v23, 1e-24 }
  0xad   :  { %v176_v30 = vmax.f32 %v132_v26, 1e-24 }
  0xae   :  { %475 = vrsqrt.f32 %v175_v27 }
  0xaf   :  { %477 = vrsqrt.f32 %v176_v30  ;;  %v98_v31 = vpop.xlane.xlu0 %97 }
  0xb0   :  { %v100_v34 = vpop.xlane.xlu1 %99  ;;  %v159_v35 = vmax.f32 %v98_v31, 1e-24  ;;  %v468_v39 = vpop.eup %467 }
  0xb1   :  { %v160_v38 = vmax.f32 %v100_v34, 1e-24  ;;  %v470_v42 = vpop.eup %469  ;;  %v237_v55 = vmul.f32 %v468_v39, %v620_v0 }
  0xb2   :  { %479 = vrsqrt.f32 %v159_v35  ;;  %v221_v59 = vmul.f32 %v470_v42, %v622_v1 }
  0xb3   :  { %481 = vrsqrt.f32 %v160_v38  ;;  %v134_v43 = vpop.xlane.xlu0 %133 }
  0xb4   :  { %v136_v46 = vpop.xlane.xlu1 %135  ;;  %v472_v47 = vpop.eup %471  ;;  %v177_v50 = vmax.f32 %v134_v43, 1e-24 }
  0xb5   :  { %v178_v51 = vmax.f32 %v136_v46, 1e-24  ;;  %v474_v54 = vpop.eup %473  ;;  %v238_v58 = vmul.f32 %v472_v47, %v624_v2 }
  0xb6   :  { %483 = vrsqrt.f32 %v177_v50  ;;  %v222_v62 = vmul.f32 %v474_v54, %v630_v5 }
  0xb7   :  { %485 = vrsqrt.f32 %v178_v51  ;;  %v102_v63 = vpop.xlane.xlu0 %101  ;;  %v429_v6 = vpack.c.bf16 %v238_v58, %v237_v55 }
  0xb8   :  { %v104_v4 = vpop.xlane.xlu1 %103  ;;  %v476_v7 = vpop.eup %475  ;;  %v161_v10 = vmax.f32 %v102_v63, 1e-24  ;;  %v431_v14 = vpack.c.bf16 %v222_v62, %v221_v59 }
  0xb9   :  { %v162_v11 = vmax.f32 %v104_v4, 1e-24  ;;  %v478_v15 = vpop.eup %477  ;;  %430 = vmatprep.subr.bf16.mxu0 %v429_v6  ;;  %v239_v18 = vmul.f32 %v476_v7, %v636_v8 }
  0xba   :  { %487 = vrsqrt.f32 %v161_v10  ;;  %432 = vmatpush3.bf16.xpose.msra.mxu0 %v431_v14  ;;  %v240_v0 = vmul.f32 %v478_v15, %v638_v9 }
  0xbb   :  { %489 = vrsqrt.f32 %v162_v11  ;;  %v138_v1 = vpop.xlane.xlu0 %137 }
  0xbc   :  { %v140_v2 = vpop.xlane.xlu1 %139  ;;  %v480_v5 = vpop.eup %479  ;;  %v179_v19 = vmax.f32 %v138_v1, 1e-24  ;;  %v433_v23 = vpack.c.bf16 %v240_v0, %v239_v18 }
  0xbd   :  { %v180_v22 = vmax.f32 %v140_v2, 1e-24  ;;  %v482_v26 = vpop.eup %481  ;;  %v223_v27 = vmul.f32 %v480_v5, %v644_v12 }
  0xbe   :  { %491 = vrsqrt.f32 %v179_v19  ;;  %434 = vmatprep.subr.bf16.mxu0 %v433_v23  ;;  %v224_v30 = vmul.f32 %v482_v26, %v646_v13 }
  0xbf   :  { %493 = vrsqrt.f32 %v180_v22  ;;  %v106_v8 = vpop.xlane.xlu0 %105 }
  0xc0   :  { %v108_v31 = vpop.xlane.xlu1 %107  ;;  %v484_v34 = vpop.eup %483  ;;  %v163_v35 = vmax.f32 %v106_v8, 1e-24  ;;  %v435_v38 = vpack.c.bf16 %v224_v30, %v223_v27 }
  0xc1   :  { %v164_v9 = vmax.f32 %v108_v31, 1e-24  ;;  %v486_v39 = vpop.eup %485  ;;  %v241_v42 = vmul.f32 %v484_v34, %v652_v16 }
  0xc2   :  { %495 = vrsqrt.f32 %v163_v35  ;;  %436 = vmatpush3.bf16.xpose.msra.mxu0 %v435_v38  ;;  %v242_v43 = vmul.f32 %v486_v39, %v654_v17 }
  0xc3   :  { %497 = vrsqrt.f32 %v164_v9  ;;  %v142_v12 = vpop.xlane.xlu0 %141 }
  0xc4   :  { %v144_v46 = vpop.xlane.xlu1 %143  ;;  %v488_v47 = vpop.eup %487  ;;  %v181_v50 = vmax.f32 %v142_v12, 1e-24  ;;  %v437_v51 = vpack.c.bf16 %v242_v43, %v241_v42 }
  0xc5   :  { %v182_v13 = vmax.f32 %v144_v46, 1e-24  ;;  %v490_v54 = vpop.eup %489  ;;  %v225_v55 = vmul.f32 %v488_v47, %v660_v20 }
  0xc6   :  { %499 = vrsqrt.f32 %v181_v50  ;;  %438 = vmatprep.subr.bf16.mxu0 %v437_v51  ;;  %v226_v58 = vmul.f32 %v490_v54, %v662_v21 }
  0xc7   :  { %501 = vrsqrt.f32 %v182_v13  ;;  %v110_v16 = vpop.xlane.xlu0 %109 }
  0xc8   :  { %v112_v59 = vpop.xlane.xlu1 %111  ;;  %v492_v62 = vpop.eup %491  ;;  %v165_v63 = vmax.f32 %v110_v16, 1e-24  ;;  %v439_v4 = vpack.c.bf16 %v226_v58, %v225_v55 }
  0xc9   :  { %v166_v17 = vmax.f32 %v112_v59, 1e-24  ;;  %v494_v6 = vpop.eup %493  ;;  %v243_v7 = vmul.f32 %v492_v62, %v668_v24 }
  0xca   :  { %503 = vrsqrt.f32 %v165_v63  ;;  %440 = vmatpush3.bf16.xpose.msra.mxu0 %v439_v4  ;;  %v244_v10 = vmul.f32 %v494_v6, %v670_v25 }
  0xcb   :  { %505 = vrsqrt.f32 %v166_v17  ;;  %v146_v20 = vpop.xlane.xlu0 %145 }
  0xcc   :  { %v148_v11 = vpop.xlane.xlu1 %147  ;;  %v496_v14 = vpop.eup %495  ;;  %v183_v15 = vmax.f32 %v146_v20, 1e-24  ;;  %v441_v18 = vpack.c.bf16 %v244_v10, %v243_v7 }
  0xcd   :  { %v184_v21 = vmax.f32 %v148_v11, 1e-24  ;;  %v498_v0 = vpop.eup %497  ;;  %v227_v1 = vmul.f32 %v496_v14, %v676_v28 }
  0xce   :  { %507 = vrsqrt.f32 %v183_v15  ;;  %442 = vmatprep.subr.bf16.mxu0 %v441_v18  ;;  %v228_v2 = vmul.f32 %v498_v0, %v678_v29 }
  0xcf   :  { %509 = vrsqrt.f32 %v184_v21  ;;  %v114_v24 = vpop.xlane.xlu0 %113 }
  0xd0   :  { %v116_v5 = vpop.xlane.xlu1 %115  ;;  %v500_v19 = vpop.eup %499  ;;  %v167_v22 = vmax.f32 %v114_v24, 1e-24  ;;  %v443_v23 = vpack.c.bf16 %v228_v2, %v227_v1 }
  0xd1   :  { %v168_v25 = vmax.f32 %v116_v5, 1e-24  ;;  %v502_v26 = vpop.eup %501  ;;  %v245_v27 = vmul.f32 %v500_v19, %v684_v32 }
  0xd2   :  { %511 = vrsqrt.f32 %v167_v22  ;;  %444 = vmatpush3.bf16.xpose.msra.mxu0 %v443_v23  ;;  %v246_v30 = vmul.f32 %v502_v26, %v686_v33 }
  0xd3   :  { %513 = vrsqrt.f32 %v168_v25  ;;  %v150_v28 = vpop.xlane.xlu0 %149 }
  0xd4   :  { %v152_v8 = vpop.xlane.xlu1 %151  ;;  %v504_v31 = vpop.eup %503  ;;  %v185_v34 = vmax.f32 %v150_v28, 1e-24  ;;  %v445_v35 = vpack.c.bf16 %v246_v30, %v245_v27 }
  0xd5   :  { %v186_v29 = vmax.f32 %v152_v8, 1e-24  ;;  %v506_v9 = vpop.eup %505  ;;  %v229_v38 = vmul.f32 %v504_v31, %v692_v36 }
  0xd6   :  { %515 = vrsqrt.f32 %v185_v34  ;;  %446 = vmatprep.subr.bf16.mxu0 %v445_v35  ;;  %v230_v39 = vmul.f32 %v506_v9, %v694_v37 }
  0xd7   :  { %517 = vrsqrt.f32 %v186_v29  ;;  %v118_v32 = vpop.xlane.xlu0 %117 }
  0xd8   :  { %v120_v42 = vpop.xlane.xlu1 %119  ;;  %v508_v43 = vpop.eup %507  ;;  %v169_v12 = vmax.f32 %v118_v32, 1e-24  ;;  %v447_v46 = vpack.c.bf16 %v230_v39, %v229_v38 }
  0xd9   :  { %v170_v33 = vmax.f32 %v120_v42, 1e-24  ;;  %v510_v47 = vpop.eup %509  ;;  %v247_v50 = vmul.f32 %v508_v43, %v700_v40 }
  0xda   :  { %519 = vrsqrt.f32 %v169_v12  ;;  %448 = vmatpush3.bf16.xpose.msra.mxu0 %v447_v46  ;;  %v248_v13 = vmul.f32 %v510_v47, %v702_v41 }
  0xdb   :  { %521 = vrsqrt.f32 %v170_v33  ;;  %v154_v36 = vpop.xlane.xlu0 %153 }
  0xdc   :  { %v156_v51 = vpop.xlane.xlu1 %155  ;;  %v512_v54 = vpop.eup %511  ;;  %v187_v55 = vmax.f32 %v154_v36, 1e-24  ;;  %v449_v58 = vpack.c.bf16 %v248_v13, %v247_v50 }
  0xdd   :  { %v188_v37 = vmax.f32 %v156_v51, 1e-24  ;;  %v514_v16 = vpop.eup %513  ;;  %v231_v59 = vmul.f32 %v512_v54, %v708_v44 }
  0xde   :  { %523 = vrsqrt.f32 %v187_v55  ;;  %450 = vmatprep.subr.bf16.mxu0 %v449_v58  ;;  %v232_v62 = vmul.f32 %v514_v16, %v710_v45 }
  0xdf   :  { %525 = vrsqrt.f32 %v188_v37  ;;  %v122_v40 = vpop.xlane.xlu0 %121 }
  0xe0   :  { %v124_v63 = vpop.xlane.xlu1 %123  ;;  %v516_v17 = vpop.eup %515  ;;  %v171_v4 = vmax.f32 %v122_v40, 1e-24  ;;  %v451_v6 = vpack.c.bf16 %v232_v62, %v231_v59 }
  0xe1   :  { %v172_v41 = vmax.f32 %v124_v63, 1e-24  ;;  %v518_v7 = vpop.eup %517  ;;  %v249_v10 = vmul.f32 %v516_v17, %v716_v48 }
  0xe2   :  { %527 = vrsqrt.f32 %v171_v4  ;;  %452 = vmatpush3.bf16.xpose.msra.mxu0 %v451_v6  ;;  %v250_v20 = vmul.f32 %v518_v7, %v718_v49 }
  0xe3   :  { %529 = vrsqrt.f32 %v172_v41 }
  0xe4   :  { %v520_v44 = vpop.eup %519  ;;  %v453_v11 = vpack.c.bf16 %v250_v20, %v249_v10 }
  0xe5   :  { %v522_v14 = vpop.eup %521  ;;  %v233_v45 = vmul.f32 %v520_v44, %v724_v52 }
  0xe6   :  { %454 = vmatprep.subr.bf16.mxu0 %v453_v11  ;;  %v234_v15 = vmul.f32 %v522_v14, %v726_v53 }
  0xe7   :  { %v369_v32 = vpop.permute.xlu0 %368 }
  0xe8   :  { %v524_v21 = vpop.eup %523  ;;  %v455_v18 = vpack.c.bf16 %v234_v15, %v233_v45 }
  0xe9   :  { %v526_v0 = vpop.eup %525  ;;  %v251_v1 = vmul.f32 %v524_v21, %v732_v56 }
  0xea   :  { %456 = vmatpush3.bf16.xpose.msra.mxu0 %v455_v18  ;;  %v252_v48 = vmul.f32 %v526_v0, %v734_v57 }
  0xec   :  { %v528_v2 = vpop.eup %527  ;;  %v457_v24 = vpack.c.bf16 %v252_v48, %v251_v1 }
  0xed   :  { %v530_v49 = vpop.eup %529  ;;  %v235_v5 = vmul.f32 %v528_v2, %v740_v60  ;;  %v359_v60 = vlaneseq }
  0xee   :  { %458 = vmatprep.subr.bf16.mxu0 %v457_v24  ;;  %v236_v19 = vmul.f32 %v530_v49, %v742_v61 }
  0xef   :  { %v360_v31 = vand.u32 127, %v359_v60 }
  0xf0   :  { %v459_v52 = vpack.c.bf16 %v236_v19, %v235_v5 }
  0xf1   :  { %v361_v39 = vadd.s32 128, %v360_v31  ;;  %vm370_vm4 = vcmp.eq.s32.totalorder %v360_v31, %v369_v32 }
  0xf2   :  { %460 = vmatpush3.bf16.xpose.msra.mxu0 %v459_v52 }
  0xf3   :  { %vm371_vm6 = vcmp.eq.s32.totalorder %v361_v39, %v369_v32 }
  0xf9   :  { %428 = vmatmul.mubr.f32.vlgmr.msra.gmra.mrb[0].mxu0 %v751_v3 }
 0x1cc   :  { %v320_v53 = vpop.f32.mrb[0].mxu0 }
 0x1cd   :  { %v325_v22 = vmul.f32 %v320_v53, %v320_v53  ;;  %v322_v25 = vpop.f32.mrb[1].mxu0  ;;  %v347_v43 = vmul.f32 0.87758255, %v320_v53  ;;  %v393_v50 = vadd.f32 -0.23971277, %v320_v53 }
 0x1ce   :  { %v326_v23 = vmul.f32 %v322_v25, %v322_v25  ;;  %v348_v46 = vmul.f32 0.87758255, %v322_v25  ;;  %v394_v51 = vadd.f32 -0.23971277, %v322_v25  ;;  %vm353_vm5 = vcmp.gt.f32.partialorder %v320_v53, -0.87758255 }
 0x1cf   :  { %v327_v56 = vsub.f32 1.0, %v325_v22  ;;  %vm354_vm7 = vcmp.gt.f32.partialorder %v322_v25, -0.87758255 }
 0x1d0   :  { %v328_v26 = vsub.f32 1.0, %v326_v23 }
 0x1d1   :  { %v329_v27 = vmax.f32 %v327_v56, 0.0 }
 0x1d2   :  { %v330_v57 = vmax.f32 %v328_v26, 0.0 }
 0x1d3   :  { %v331_v30 = vmin.f32 %v329_v27, 1.0 }
 0x1d4   :  { %v332_v28 = vmin.f32 %v330_v57, 1.0 }
 0x1d5   :  { %531 = vrsqrt.f32 %v331_v30  ;;  %vm335_vm0 = vcmp.eq.f32.partialorder %v331_v30, inf  ;;  %v338_v3 = vand.u32 2147483648, %v331_v30  ;;  %vm337_vm2 = vcmp.eq.f32.partialorder %v331_v30, 0.0 }
 0x1d6   :  { %533 = vrsqrt.f32 %v332_v28  ;;  %vm342_vm1 = vcmp.eq.f32.partialorder %v332_v28, inf  ;;  %v345_v35 = vand.u32 2147483648, %v332_v28  ;;  %vm344_vm3 = vcmp.eq.f32.partialorder %v332_v28, 0.0 }
 0x1df   :  { %v532_v8 = vpop.eup %531 }
 0x1e0   :  { %v534_v61 = vpop.eup %533  ;;  %v334_v34 = vmul.f32 %v532_v8, %v331_v30 }
 0x1e1   :  { %v341_v29 = vmul.f32 %v534_v61, %v332_v28 }
 0x1e2   :  { %v336_v9 = vsel %vm335_vm0, %v331_v30, %v334_v34 }
 0x1e3   :  { %v343_v38 = vsel %vm342_vm1, %v332_v28, %v341_v29  ;;  %v339_v42 = vsel %vm337_vm2, %v338_v3, %v336_v9 }
 0x1e4   :  { %v346_v12 = vsel %vm344_vm3, %v345_v35, %v343_v38  ;;  %v349_v33 = vmul.f32 0.47942555, %v339_v42 }
 0x1e5   :  { %v350_v47 = vmul.f32 0.47942555, %v346_v12 }
 0x1e6   :  { %v351_v13 = vsub.f32 %v347_v43, %v349_v33 }
 0x1e7   :  { %v352_v36 = vsub.f32 %v348_v46, %v350_v47 }
 0x1e8   :  { %v357_v54 = vsel %vm353_vm5, %v351_v13, %v393_v50 }
 0x1e9   :  { %v358_v55 = vsel %vm354_vm7, %v352_v36, %v394_v51  ;;  %v372_v37 = vsel %vm370_vm4, %v357_v54, %v320_v53 }
 0x1ea   :  { %v373_v58 = vsel %vm371_vm6, %v358_v55, %v322_v25  ;;  %v374_v16 = vmul.f32 30.0, %v372_v37 }
 0x1eb   :  { %v375_v59 = vmul.f32 30.0, %v373_v58 }
 0x1ec   :  { %376 = vst [vmem:[#allocation5] sm:$0xff] %v374_v16 }
 0x1ed   :  { %377 = vst [vmem:[#allocation5 + $0x8] sm:$0xff] %v375_v59 }
 0x1ee   :  { %568 = shalt.err (!%p565_p12)
}
 0x1ef   :  { %s569_s5 = scalar_lea.hbm %s805_s3, 256 }
 0x1f0   :  { %p570_p13 = scmp.ne.s32.totalorder %s805_s3, %s569_s5  ;;  %p573_p0 = scmp.lt.u32.totalorder %s569_s5, %s805_s3 }
 0x1f2   :  { %p575_p1 = pnand %p573_p0, %p570_p13 }
 0x1f4   :  { %578 = shalt.err (!%p575_p1)
}
 0x1f5   :  { %387 = dma.vmem_to_hbm [thread:$0]  %s385_s2, 256, %s805_s3, [#allocation4]  }
 0x1f6   :  { %581 = dma.done.wait [#allocation4], 256  }
 0x1f7   :  { %582 = vsyncadd [#allocation4], 4294967040 }
 0x1f8   :  { %391 = vsyncpa [#allocation3], 1 }
 0x1f9   :  { %392 = vsyncpa [#allocation4], 1 }

</bundles_post_ra>
